<compile_context>
chip_gen: v7x
topology: tpu7x:2x2x1
jax: 0.10.0
libtpu: 0.0.40
codegen_flags: <defaults>
</compile_context>

<pallas_src>
import functools

import jax
import jax.numpy as jnp
from jax.experimental import pallas as pl
from jax.experimental.pallas import tpu as pltpu


def _round_up(x, m):
    return ((x + m - 1) // m) * m


def _triplet_kernel(a_ref, p_ref, n_ref, out_ref, accp_ref, accn_ref,
                    *, margin, d, td):
    k = pl.program_id(1)

    @pl.when(k == 0)
    def _():
        accp_ref[...] = jnp.zeros_like(accp_ref)
        accn_ref[...] = jnp.zeros_like(accn_ref)

    # Native-dtype tiles off the DMA; upcast to f32 in-kernel (hidden under DMA).
    a = a_ref[...].astype(jnp.float32)
    dp = a - p_ref[...].astype(jnp.float32)
    dn = a - n_ref[...].astype(jnp.float32)
    sq_p = dp * dp
    sq_n = dn * dn

    if d % td != 0:
        # Partial last feature tile: OOB columns contain garbage that would
        # corrupt valid rows -> select them to zero (static check, VPU selects).
        col = k * td + jax.lax.broadcasted_iota(jnp.int32, sq_p.shape, 1)
        valid = col < d
        sq_p = jnp.where(valid, sq_p, 0.0)
        sq_n = jnp.where(valid, sq_n, 0.0)

    # Lane-dense accumulation: fold td columns into 128 lanes with pure VPU
    # adds (lane-aligned static slices); defer the cross-lane reduce.
    ap = accp_ref[...]
    an = accn_ref[...]
    for g in range(td // 128):
        ap = ap + sq_p[:, g * 128:(g + 1) * 128]
        an = an + sq_n[:, g * 128:(g + 1) * 128]
    accp_ref[...] = ap
    accn_ref[...] = an

    @pl.when(k == pl.num_programs(1) - 1)
    def _():
        dist_p = jnp.sqrt(jnp.sum(accp_ref[...], axis=1, keepdims=True))
        dist_n = jnp.sqrt(jnp.sum(accn_ref[...], axis=1, keepdims=True))
        hinge = jnp.maximum(dist_p - dist_n + margin, 0.0)
        # Coalesced lane-dense output: col 0 = dist_p, col 1 = dist_n,
        # col 2 = hinge, rest zero -> one unmasked (tm, 128) store.
        lane = jax.lax.broadcasted_iota(jnp.int32, out_ref.shape, 1)
        out_ref[...] = jnp.where(
            lane == 0, dist_p,
            jnp.where(lane == 1, dist_n,
                      jnp.where(lane == 2, hinge, 0.0)))


def triplet_margin_distances(a, p, n, *, margin=1.0, tb=512, td_max=2048):
    """Returns (loss, dist_p, dist_n) — matching the module's forward + attrs."""
    assert a.shape == p.shape == n.shape and a.ndim == 2
    assert a.dtype == p.dtype == n.dtype
    N, D = a.shape

    itemsize = jnp.dtype(a.dtype).itemsize
    # Sublane alignment of the native tiling: 8 (f32), 16 (bf16), 32 (int8/fp8).
    row_align = 8 * max(1, 4 // itemsize)

    # Feature tile: lane-aligned, kept at td_max (no divide-down pathology);
    # the partial last tile is handled by pl.cdiv + in-kernel masking.
    td_max = max(128, (int(td_max) // 128) * 128)
    td = min(_round_up(D, 128), td_max)

    # Row tile: aligned to the sublane tiling; for N > 8 ensure >= 2 row
    # blocks so both TensorCores get work on megacore parts (v7x).
    tb = max(row_align, (int(tb) // row_align) * row_align)
    if N <= row_align:
        tm = row_align
    else:
        tm = min(tb, _round_up((N + 1) // 2, row_align))

    grid = (pl.cdiv(N, tm), pl.cdiv(D, td))

    # VMEM budget: double-buffered inputs + output + two lane-dense scratches.
    vmem_bytes = (3 * 2 * tm * td * itemsize
                  + 2 * tm * 128 * 4
                  + 2 * tm * 128 * 4)
    vmem_limit = max(int(vmem_bytes * 1.25) + (2 << 20), 32 << 20)

    kernel = functools.partial(_triplet_kernel, margin=float(margin), d=D, td=td)

    out = pl.pallas_call(
        kernel,
        out_shape=jax.ShapeDtypeStruct((N, 128), jnp.float32),
        grid_spec=pltpu.PrefetchScalarGridSpec(
            num_scalar_prefetch=0,
            grid=grid,
            in_specs=[
                pl.BlockSpec((tm, td), lambda i, k: (i, k)),
                pl.BlockSpec((tm, td), lambda i, k: (i, k)),
                pl.BlockSpec((tm, td), lambda i, k: (i, k)),
            ],
            out_specs=pl.BlockSpec((tm, 128), lambda i, k: (i, 0)),
            scratch_shapes=[pltpu.VMEM((tm, 128), jnp.float32),
                            pltpu.VMEM((tm, 128), jnp.float32)],
        ),
        compiler_params=pltpu.CompilerParams(
            dimension_semantics=("parallel", "arbitrary"),
            vmem_limit_bytes=vmem_limit),
    )(a, p, n)

    dist_p = out[:, 0]
    dist_n = out[:, 1]
    loss = jnp.mean(out[:, 2])   # mean over N scalars — plain-JAX glue
    return loss, dist_p, dist_n


def triplet_margin_loss(a, p, n, margin=1.0):
    """Equivalent of TripletMarginLoss.forward(a, p, n) -> scalar loss."""
    loss, _, _ = triplet_margin_distances(a, p, n, margin=margin)
    return loss


# TODO(synk): the module's test() / get_batch_accuracy() helpers (anchor-vs-all
# negatives distance matrix, accuracy bookkeeping) are not part of forward()
# and are not implemented here.


if __name__ == "__main__":
    key = jax.random.PRNGKey(0)
    ka, kp, kn = jax.random.split(key, 3)

    def ref(a, p, n, margin):
        dp = jnp.sqrt(jnp.sum((a - p) ** 2, axis=1))
        dn = jnp.sqrt(jnp.sum((a - n) ** 2, axis=1))
        return jnp.mean(jnp.maximum(dp - dn + margin, 0.0)), dp, dn

    # Small shapes consistent with the module: a batch of 6 triplets of
    # 300-dim embeddings (not multiples of 8 / 128 -> partial-block paths).
    N, D = 6, 300
    a = jax.random.normal(ka, (N, D), dtype=jnp.float32)
    p = jax.random.normal(kp, (N, D), dtype=jnp.float32)
    n = jax.random.normal(kn, (N, D), dtype=jnp.float32)

    fwd = jax.jit(functools.partial(triplet_margin_distances, margin=1.0))
    loss, dist_p, dist_n = jax.block_until_ready(fwd(a, p, n))
    ref_loss, ref_dp, ref_dn = ref(a, p, n, 1.0)
    assert loss.shape == ()
    assert bool(jnp.isfinite(loss))
    assert jnp.allclose(dist_p, ref_dp, rtol=1e-5, atol=1e-5)
    assert jnp.allclose(dist_n, ref_dn, rtol=1e-5, atol=1e-5)
    assert jnp.allclose(loss, ref_loss, rtol=1e-5, atol=1e-5)

    # Multi-block path: several row blocks + several feature blocks, with
    # partial tails on both axes.
    N2, D2 = 20, 300
    a2 = jax.random.normal(ka, (N2, D2), dtype=jnp.float32)
    p2 = jax.random.normal(kp, (N2, D2), dtype=jnp.float32)
    n2 = jax.random.normal(kn, (N2, D2), dtype=jnp.float32)
    loss2, dp2, dn2 = jax.block_until_ready(
        triplet_margin_distances(a2, p2, n2, margin=0.5, tb=8, td_max=128))
    rl2, rdp2, rdn2 = ref(a2, p2, n2, 0.5)
    assert jnp.allclose(dp2, rdp2, rtol=1e-5, atol=1e-5)
    assert jnp.allclose(dn2, rdn2, rtol=1e-5, atol=1e-5)
    assert jnp.allclose(loss2, rl2, rtol=1e-5, atol=1e-5)

    # bf16 inputs stay bf16 on the DMA; kernel upcasts to f32 internally.
    ab, pb, nb = (x.astype(jnp.bfloat16) for x in (a2, p2, n2))
    loss3, dp3, dn3 = jax.block_until_ready(
        triplet_margin_distances(ab, pb, nb, margin=1.0))
    rl3, rdp3, rdn3 = ref(ab.astype(jnp.float32), pb.astype(jnp.float32),
                          nb.astype(jnp.float32), 1.0)
    assert jnp.allclose(dp3, rdp3, rtol=1e-4, atol=1e-4)
    assert jnp.allclose(dn3, rdn3, rtol=1e-4, atol=1e-4)
    assert jnp.allclose(loss3, rl3, rtol=1e-4, atol=1e-4)

    print("KERNEL_OK")
</pallas_src>

<mosaic_0001>
module attributes {stable_mosaic.version = 11 : i64} {
  func.func @_triplet_kernel(%arg0: i32, %arg1: i32, %arg2: memref<8x384xf32, #tpu.memory_space<vmem>>, %arg3: memref<8x384xf32, #tpu.memory_space<vmem>>, %arg4: memref<8x384xf32, #tpu.memory_space<vmem>>, %arg5: memref<8x128xf32, #tpu.memory_space<vmem>>, %arg6: memref<8x128xf32, #tpu.memory_space<vmem>>, %arg7: memref<8x128xf32, #tpu.memory_space<vmem>>) attributes {dimension_semantics = [#tpu.dimension_semantics<parallel>, #tpu.dimension_semantics<arbitrary>], iteration_bounds = array<i64: 1, 1>, scalar_prefetch = 0 : i64, scratch_operands = 2 : i64, tpu.core_type = #tpu.core_type<tc>, window_params = [{transform_indices = @transform_0, window_bounds = array<i64: 8, 384>}, {transform_indices = @transform_1, window_bounds = array<i64: 8, 384>}, {transform_indices = @transform_2, window_bounds = array<i64: 8, 384>}, {transform_indices = @transform_3, window_bounds = array<i64: 8, 128>}]} {
    %c0_i32 = arith.constant 0 : i32
    %0 = arith.cmpi eq, %arg1, %c0_i32 : i32
    %1 = arith.extui %0 : i1 to i32
    %c0_i32_0 = arith.constant 0 : i32
    %2 = arith.cmpi ne, %1, %c0_i32_0 : i32
    scf.if %2 {
      %cst_17 = arith.constant 0.000000e+00 : f32
      %39 = vector.broadcast %cst_17 : f32 to vector<8x128xf32>
      %c0_18 = arith.constant 0 : index
      %c0_19 = arith.constant 0 : index
      %40 = vector.load %arg6[%c0_18, %c0_19] : memref<8x128xf32, #tpu.memory_space<vmem>>, vector<8x128xf32>
      tpu.vector_store %arg6[%c0_18, %c0_19], %39 {strides = array<i32>} : memref<8x128xf32, #tpu.memory_space<vmem>>, vector<8x128xf32>,
      %cst_20 = arith.constant 0.000000e+00 : f32
      %41 = vector.broadcast %cst_20 : f32 to vector<8x128xf32>
      %c0_21 = arith.constant 0 : index
      %c0_22 = arith.constant 0 : index
      %42 = vector.load %arg7[%c0_21, %c0_22] : memref<8x128xf32, #tpu.memory_space<vmem>>, vector<8x128xf32>
      tpu.vector_store %arg7[%c0_21, %c0_22], %41 {strides = array<i32>} : memref<8x128xf32, #tpu.memory_space<vmem>>, vector<8x128xf32>,
    } else {
    }
    %c0 = arith.constant 0 : index
    %c0_1 = arith.constant 0 : index
    %3 = vector.load %arg2[%c0, %c0_1] : memref<8x384xf32, #tpu.memory_space<vmem>>, vector<8x384xf32>
    %c0_2 = arith.constant 0 : index
    %c0_3 = arith.constant 0 : index
    %4 = vector.load %arg3[%c0_2, %c0_3] : memref<8x384xf32, #tpu.memory_space<vmem>>, vector<8x384xf32>
    %5 = arith.subf %3, %4 : vector<8x384xf32>
    %c0_4 = arith.constant 0 : index
    %c0_5 = arith.constant 0 : index
    %6 = vector.load %arg4[%c0_4, %c0_5] : memref<8x384xf32, #tpu.memory_space<vmem>>, vector<8x384xf32>
    %7 = arith.subf %3, %6 : vector<8x384xf32>
    %8 = arith.mulf %5, %5 : vector<8x384xf32>
    %9 = arith.mulf %7, %7 : vector<8x384xf32>
    %c384_i32 = arith.constant 384 : i32
    %10 = arith.muli %arg1, %c384_i32 : i32
    %11 = tpu.iota {dimensions = array<i32: 1>} : vector<8x384xi32>
    %12 = vector.broadcast %10 : i32 to vector<8x384xi32>
    %13 = arith.addi %12, %11 : vector<8x384xi32>
    %c300_i32 = arith.constant 300 : i32
    %14 = vector.broadcast %c300_i32 : i32 to vector<8x384xi32>
    %15 = arith.cmpi slt, %13, %14 : vector<8x384xi32>
    %cst = arith.constant 0.000000e+00 : f32
    %16 = vector.broadcast %cst : f32 to vector<8x384xf32>
    %17 = arith.select %15, %8, %16 : vector<8x384xi1>, vector<8x384xf32>
    %cst_6 = arith.constant 0.000000e+00 : f32
    %18 = vector.broadcast %cst_6 : f32 to vector<8x384xf32>
    %19 = arith.select %15, %9, %18 : vector<8x384xi1>, vector<8x384xf32>
    %c0_7 = arith.constant 0 : index
    %c0_8 = arith.constant 0 : index
    %20 = vector.load %arg6[%c0_7, %c0_8] : memref<8x128xf32, #tpu.memory_space<vmem>>, vector<8x128xf32>
    %c0_9 = arith.constant 0 : index
    %c0_10 = arith.constant 0 : index
    %21 = vector.load %arg7[%c0_9, %c0_10] : memref<8x128xf32, #tpu.memory_space<vmem>>, vector<8x128xf32>
    %22 = vector.extract_strided_slice %17 {offsets = [0, 0], sizes = [8, 128], strides = [1, 1]} : vector<8x384xf32> to vector<8x128xf32>
    %23 = arith.addf %20, %22 : vector<8x128xf32>
    %24 = vector.extract_strided_slice %19 {offsets = [0, 0], sizes = [8, 128], strides = [1, 1]} : vector<8x384xf32> to vector<8x128xf32>
    %25 = arith.addf %21, %24 : vector<8x128xf32>
    %26 = vector.extract_strided_slice %17 {offsets = [0, 128], sizes = [8, 128], strides = [1, 1]} : vector<8x384xf32> to vector<8x128xf32>
    %27 = arith.addf %23, %26 : vector<8x128xf32>
    %28 = vector.extract_strided_slice %19 {offsets = [0, 128], sizes = [8, 128], strides = [1, 1]} : vector<8x384xf32> to vector<8x128xf32>
    %29 = arith.addf %25, %28 : vector<8x128xf32>
    %30 = vector.extract_strided_slice %17 {offsets = [0, 256], sizes = [8, 128], strides = [1, 1]} : vector<8x384xf32> to vector<8x128xf32>
    %31 = arith.addf %27, %30 : vector<8x128xf32>
    %32 = vector.extract_strided_slice %19 {offsets = [0, 256], sizes = [8, 128], strides = [1, 1]} : vector<8x384xf32> to vector<8x128xf32>
    %33 = arith.addf %29, %32 : vector<8x128xf32>
    %c0_11 = arith.constant 0 : index
    %c0_12 = arith.constant 0 : index
    %34 = vector.load %arg6[%c0_11, %c0_12] : memref<8x128xf32, #tpu.memory_space<vmem>>, vector<8x128xf32>
    tpu.vector_store %arg6[%c0_11, %c0_12], %31 {strides = array<i32>} : memref<8x128xf32, #tpu.memory_space<vmem>>, vector<8x128xf32>,
    %c0_13 = arith.constant 0 : index
    %c0_14 = arith.constant 0 : index
    %35 = vector.load %arg7[%c0_13, %c0_14] : memref<8x128xf32, #tpu.memory_space<vmem>>, vector<8x128xf32>
    tpu.vector_store %arg7[%c0_13, %c0_14], %33 {strides = array<i32>} : memref<8x128xf32, #tpu.memory_space<vmem>>, vector<8x128xf32>,
    %c0_i32_15 = arith.constant 0 : i32
    %36 = arith.cmpi eq, %arg1, %c0_i32_15 : i32
    %37 = arith.extui %36 : i1 to i32
    %c0_i32_16 = arith.constant 0 : i32
    %38 = arith.cmpi ne, %37, %c0_i32_16 : i32
    scf.if %38 {
      %c0_17 = arith.constant 0 : index
      %c0_18 = arith.constant 0 : index
      %39 = vector.load %arg6[%c0_17, %c0_18] : memref<8x128xf32, #tpu.memory_space<vmem>>, vector<8x128xf32>
      %cst_19 = arith.constant dense<0.000000e+00> : vector<8xf32>
      %40 = vector.multi_reduction <add>, %39, %cst_19 [1] : vector<8x128xf32> to vector<8xf32>
      %41 = vector.shape_cast %40 : vector<8xf32> to vector<8x1xf32>
      %42 = math.sqrt %41 : vector<8x1xf32>
      %c0_20 = arith.constant 0 : index
      %c0_21 = arith.constant 0 : index
      %43 = vector.load %arg7[%c0_20, %c0_21] : memref<8x128xf32, #tpu.memory_space<vmem>>, vector<8x128xf32>
      %cst_22 = arith.constant dense<0.000000e+00> : vector<8xf32>
      %44 = vector.multi_reduction <add>, %43, %cst_22 [1] : vector<8x128xf32> to vector<8xf32>
      %45 = vector.shape_cast %44 : vector<8xf32> to vector<8x1xf32>
      %46 = math.sqrt %45 : vector<8x1xf32>
      %47 = arith.subf %42, %46 : vector<8x1xf32>
      %cst_23 = arith.constant 1.000000e+00 : f32
      %48 = vector.broadcast %cst_23 : f32 to vector<8x1xf32>
      %49 = arith.addf %47, %48 : vector<8x1xf32>
      %cst_24 = arith.constant 0.000000e+00 : f32
      %50 = vector.broadcast %cst_24 : f32 to vector<8x1xf32>
      %51 = arith.maximumf %49, %50 : vector<8x1xf32>
      %52 = tpu.iota {dimensions = array<i32: 1>} : vector<8x128xi32>
      %c0_i32_25 = arith.constant 0 : i32
      %53 = vector.broadcast %c0_i32_25 : i32 to vector<8x128xi32>
      %54 = arith.cmpi eq, %52, %53 : vector<8x128xi32>
      %c1_i32 = arith.constant 1 : i32
      %55 = vector.broadcast %c1_i32 : i32 to vector<8x128xi32>
      %56 = arith.cmpi eq, %52, %55 : vector<8x128xi32>
      %c2_i32 = arith.constant 2 : i32
      %57 = vector.broadcast %c2_i32 : i32 to vector<8x128xi32>
      %58 = arith.cmpi eq, %52, %57 : vector<8x128xi32>
      %cst_26 = arith.constant 0.000000e+00 : f32
      %59 = vector.shape_cast %51 : vector<8x1xf32> to vector<8x1xf32>
      %60 = vector.broadcast %59 : vector<8x1xf32> to vector<8x128xf32>
      %61 = vector.broadcast %cst_26 : f32 to vector<8x128xf32>
      %62 = arith.select %58, %60, %61 : vector<8x128xi1>, vector<8x128xf32>
      %63 = vector.shape_cast %46 : vector<8x1xf32> to vector<8x1xf32>
      %64 = vector.broadcast %63 : vector<8x1xf32> to vector<8x128xf32>
      %65 = arith.select %56, %64, %62 : vector<8x128xi1>, vector<8x128xf32>
      %66 = vector.shape_cast %42 : vector<8x1xf32> to vector<8x1xf32>
      %67 = vector.broadcast %66 : vector<8x1xf32> to vector<8x128xf32>
      %68 = arith.select %54, %67, %65 : vector<8x128xi1>, vector<8x128xf32>
      %c0_27 = arith.constant 0 : index
      %c0_28 = arith.constant 0 : index
      %69 = vector.load %arg5[%c0_27, %c0_28] : memref<8x128xf32, #tpu.memory_space<vmem>>, vector<8x128xf32>
      tpu.vector_store %arg5[%c0_27, %c0_28], %68 {strides = array<i32>} : memref<8x128xf32, #tpu.memory_space<vmem>>, vector<8x128xf32>,
    } else {
    }
    return
  }
  func.func @transform_0(%arg0: i32, %arg1: i32) -> (i32, i32) {
    %c0_i32 = arith.constant 0 : i32
    return %arg0, %arg1 : i32, i32
  }
  func.func @transform_1(%arg0: i32, %arg1: i32) -> (i32, i32) {
    %c0_i32 = arith.constant 0 : i32
    return %arg0, %arg1 : i32, i32
  }
  func.func @transform_2(%arg0: i32, %arg1: i32) -> (i32, i32) {
    %c0_i32 = arith.constant 0 : i32
    return %arg0, %arg1 : i32, i32
  }
  func.func @transform_3(%arg0: i32, %arg1: i32) -> (i32, i32) {
    %c0_i32 = arith.constant 0 : i32
    %c0_i32_0 = arith.constant 0 : i32
    return %arg0, %c0_i32 : i32, i32
  }
}

</mosaic_0001>

<bundles_post_ra>
// kernel: triplet_margin_distances.1
= control target key start
LH: loop header
LB: loop body
LE: loop exit
PB: predicated region body
PF: predicated region fallthrough
CT: control target
= control target key end

     0   :  { %8 = vsyncpa [#allocation5], 0  ;;  %s282_s0 = inlined_call_operand.hbm [shape: f32[6,300], index: 0, kind: input, shape index: {}]   ;;  %s283_s1 = inlined_call_operand.hbm [shape: f32[6,300], index: 1, kind: input, shape index: {}]   ;;  %s284_s2 = inlined_call_operand.hbm [shape: f32[6,300], index: 2, kind: input, shape index: {}]   ;;  %s285_s3 = inlined_call_operand.vmem [shape: f32[6,128], index: 3, kind: output, shape index: {}]  }
   0x1   :  { %9 = vsyncpa [#allocation7], 0  ;;  %s220_s12 = smov [#allocation6]   ;;  %s221_s14 = smov [#allocation4]  }
   0x2   :  { %s26_s13 = sshll.u32 %s220_s12, 4  ;;  %s16_s15 = sshll.u32 %s221_s14, 4  ;;  %s27_s13 = int_to_ptr.vmem [resolvable:$true] %s26_s13  ;;  %s17_s15 = int_to_ptr.vmem [resolvable:$true] %s16_s15 }
   0x3   :  { %s150_s18 = scalar_lea.hbm %s283_s1, 384 }
   0x4   :  { %p151_p0 = scmp.ne.s32.totalorder %s283_s1, %s150_s18  ;;  %p154_p1 = scmp.lt.u32.totalorder %s150_s18, %s283_s1 }
   0x6   :  { %p156_p2 = pnand %p154_p1, %p151_p0 }
   0x8   :  { %159 = shalt.err (!%p156_p2)
}
   0x9   :  { %s160_s23 = scalar_lea.vmem %s27_s13, 384  ;;  %p165_p4 = scmp.lt.s32.totalorder %s27_s13, %s27_s13 }
   0xa   :  { %p161_p3 = scmp.ne.s32.totalorder %s27_s13, %s160_s23  ;;  %p166_p5 = scmp.lt.s32.totalorder %s160_s23, %s160_s23 }
   0xc   :  { %p167_p6 = por %p166_p5, %p165_p4 }
   0xe   :  { %p168_p7 = pnand %p167_p6, %p161_p3 }
  0x10   :  { %171 = shalt.err (!%p168_p7)
}
  0x11   :  { %29 = dma.hbm_to_vmem [thread:$0]  %s283_s1, 384, %s27_s13, [#allocation7]  }
  0x12   :  { %s172_s28 = scalar_lea.hbm %s282_s0, 384 }
  0x13   :  { %p173_p8 = scmp.ne.s32.totalorder %s282_s0, %s172_s28  ;;  %p176_p9 = scmp.lt.u32.totalorder %s172_s28, %s282_s0 }
  0x15   :  { %p178_p10 = pnand %p176_p9, %p173_p8 }
  0x17   :  { %181 = shalt.err (!%p178_p10)
}
  0x18   :  { %s182_s6 = scalar_lea.vmem %s17_s15, 384  ;;  %p187_p12 = scmp.lt.s32.totalorder %s17_s15, %s17_s15 }
  0x19   :  { %p183_p11 = scmp.ne.s32.totalorder %s17_s15, %s182_s6  ;;  %p188_p13 = scmp.lt.s32.totalorder %s182_s6, %s182_s6 }
  0x1b   :  { %p189_p0 = por %p188_p13, %p187_p12 }
  0x1d   :  { %p190_p1 = pnand %p189_p0, %p183_p11 }
  0x1f   :  { %193 = shalt.err (!%p190_p1)
}
  0x20   :  { %19 = dma.hbm_to_vmem [thread:$0]  %s282_s0, 384, %s17_s15, [#allocation5]  }
  0x21   :  { %s222_s8 = smov [#allocation8]   ;;  %s194_s12 = scalar_lea.hbm %s284_s2, 384 }
  0x22   :  { %s36_s9 = sshll.u32 %s222_s8, 4  ;;  %p195_p2 = scmp.ne.s32.totalorder %s284_s2, %s194_s12  ;;  %s37_s9 = int_to_ptr.vmem [resolvable:$true] %s36_s9 }
  0x23   :  { %p198_p3 = scmp.lt.u32.totalorder %s194_s12, %s284_s2 }
  0x25   :  { %p200_p4 = pnand %p198_p3, %p195_p2 }
  0x27   :  { %203 = shalt.err (!%p200_p4)
}
  0x28   :  { %s204_s18 = scalar_lea.vmem %s37_s9, 384  ;;  %p209_p6 = scmp.lt.s32.totalorder %s37_s9, %s37_s9 }
  0x29   :  { %p205_p5 = scmp.ne.s32.totalorder %s37_s9, %s204_s18  ;;  %p210_p7 = scmp.lt.s32.totalorder %s204_s18, %s204_s18 }
  0x2b   :  { %p211_p8 = por %p210_p7, %p209_p6 }
  0x2d   :  { %p212_p9 = pnand %p211_p8, %p205_p5 }
  0x2f   :  { %215 = shalt.err (!%p212_p9)
}
  0x30   :  { %39 = dma.hbm_to_vmem [thread:$0]  %s284_s2, 384, %s37_s9, [#allocation7]  }
  0x31   :  { %216 = dma.done.wait [#allocation5], 384  }
  0x32   :  { %217 = vsyncadd [#allocation5], 4294966912 }
  0x33   :  { %218 = dma.done.wait [#allocation7], 768  }
  0x34   :  { %219 = vsyncadd [#allocation7], 4294966528  ;;  %v77_v0 = vlaneseq  ;;  %v55_v3 = vld [vmem:[#allocation4] sm:$0xff]  ;;  %v56_v4 = vld [vmem:[#allocation4 + $0x8] sm:$0xff] }
  0x35   :  { %v57_v5 = vld [vmem:[#allocation4 + $0x10] sm:$0xff]  ;;  %v58_v6 = vld [vmem:[#allocation6] sm:$0xff]  ;;  %v59_v7 = vld [vmem:[#allocation6 + $0x8] sm:$0xff] }
  0x36   :  { %v78_v1 = vand.u32 127, %v77_v0  ;;  %v60_v8 = vld [vmem:[#allocation6 + $0x10] sm:$0xff]  ;;  %v61_v9 = vsub.f32 %v55_v3, %v58_v6  ;;  %v62_v10 = vsub.f32 %v56_v4, %v59_v7  ;;  %v64_v12 = vld [vmem:[#allocation8] sm:$0xff]  ;;  %v65_v13 = vld [vmem:[#allocation8 + $0x8] sm:$0xff] }
  0x37   :  { %v63_v11 = vsub.f32 %v57_v5, %v60_v8  ;;  %v66_v14 = vld [vmem:[#allocation8 + $0x10] sm:$0xff]  ;;  %v67_v15 = vsub.f32 %v55_v3, %v64_v12  ;;  %v68_v16 = vsub.f32 %v56_v4, %v65_v13 }
  0x38   :  { %v80_v2 = vadd.s32 256, %v78_v1  ;;  %v69_v17 = vsub.f32 %v57_v5, %v66_v14  ;;  %v70_v18 = vmul.f32 %v61_v9, %v61_v9  ;;  %v71_v19 = vmul.f32 %v62_v10, %v62_v10 }
  0x39   :  { %v72_v20 = vmul.f32 %v63_v11, %v63_v11  ;;  %v73_v21 = vmul.f32 %v67_v15, %v67_v15  ;;  %v74_v22 = vmul.f32 %v68_v16, %v68_v16  ;;  %vm132_vm5 = vcmp.eq.s32.totalorder %v78_v1, 2 }
  0x3a   :  { %vm87_vm0 = vcmp.lt.s32.totalorder %v80_v2, 300  ;;  %v75_v23 = vmul.f32 %v69_v17, %v69_v17  ;;  %v98_v25 = vadd.f32 %v71_v19, %v70_v18  ;;  %vm131_vm6 = vcmp.eq.s32.totalorder %v78_v1, 1 }
  0x3b   :  { %v90_v24 = vsel %vm87_vm0, %v72_v20, 0.0  ;;  %v99_v27 = vadd.f32 %v74_v22, %v73_v21  ;;  %vm130_vm7 = vcmp.eq.s32.totalorder %v78_v1, 0 }
  0x3c   :  { %v93_v26 = vsel %vm87_vm0, %v75_v23, 0.0  ;;  %v100_v28 = vadd.f32 %v98_v25, %v90_v24 }
  0x3d   :  { %v101_v29 = vadd.f32 %v99_v27, %v93_v26 }
  0x3e   :  { %108 = vadd.xlane.f32.xlu0 %v100_v28 }
  0x42   :  { %118 = vadd.xlane.f32.xlu0 %v101_v29 }
  0xcb   :  { %v109_v30 = vpop.xlane.xlu0 %108 }
  0xcc   :  { %146 = vrsqrt.f32 %v109_v30  ;;  %vm112_vm1 = vcmp.eq.f32.partialorder %v109_v30, inf  ;;  %v115_v37 = vand.u32 2147483648, %v109_v30  ;;  %vm114_vm3 = vcmp.eq.f32.partialorder %v109_v30, 0.0 }
  0xcf   :  { %v119_v31 = vpop.xlane.xlu0 %118 }
  0xd0   :  { %148 = vrsqrt.f32 %v119_v31  ;;  %vm122_vm2 = vcmp.eq.f32.partialorder %v119_v31, inf  ;;  %v125_v38 = vand.u32 2147483648, %v119_v31  ;;  %vm124_vm4 = vcmp.eq.f32.partialorder %v119_v31, 0.0 }
  0xd6   :  { %v147_v32 = vpop.eup %146 }
  0xd7   :  { %v111_v33 = vmul.f32 %v147_v32, %v109_v30 }
  0xd9   :  { %v113_v35 = vsel %vm112_vm1, %v109_v30, %v111_v33 }
  0xda   :  { %v149_v34 = vpop.eup %148  ;;  %v116_v40 = vsel %vm114_vm3, %v115_v37, %v113_v35 }
  0xdb   :  { %v121_v36 = vmul.f32 %v149_v34, %v119_v31 }
  0xdd   :  { %v123_v39 = vsel %vm122_vm2, %v119_v31, %v121_v36 }
  0xde   :  { %v126_v41 = vsel %vm124_vm4, %v125_v38, %v123_v39 }
  0xdf   :  { %v127_v42 = vsub.f32 %v116_v40, %v126_v41 }
  0xe1   :  { %v128_v43 = vadd.f32 1.0, %v127_v42 }
  0xe3   :  { %v129_v44 = vmax.f32 %v128_v43, 0.0 }
  0xe5   :  { %v133_v45 = vsel %vm132_vm5, %v129_v44, 0.0 }
  0xe6   :  { %v134_v46 = vsel %vm131_vm6, %v126_v41, %v133_v45 }
  0xe7   :  { %v135_v47 = vsel %vm130_vm7, %v116_v40, %v134_v46 }
  0xe8   :  { %136 = vst [vmem:[%s285_s3] sm:$0xff] %v135_v47 }
  0xe9   :  { %141 = vsyncpa [#allocation5], 1 }
  0xea   :  { %142 = vsyncpa [#allocation7], 1 }

</bundles_post_ra>
